<compile_context>
chip_gen: v7x
topology: tpu7x:2x2x1
jax: 0.10.0
libtpu: 0.0.40
codegen_flags: <defaults>
</compile_context>

<pallas_src>
import jax
import jax.numpy as jnp
from jax.experimental import pallas as pl
from jax.experimental.pallas import tpu as pltpu


_LANE = 128


def _chomp_copy_kernel(x_ref, o_ref):
    # x_ref, o_ref: (TR, TL) tiles of the collapsed (N*C, L_out) view.
    # Pure vld/vst stream; Pallas masks the ragged last tile on store.
    o_ref[...] = x_ref[...]


def _cdiv(a: int, b: int) -> int:
    return -(-a // b)


def _round_up(x: int, m: int) -> int:
    return _cdiv(x, m) * m


def _sublane_multiple(dtype) -> int:
    # Packed-sublane row multiples per vreg tile:
    # 8 for 4-byte dtypes, 16 for 2-byte (bf16/fp16), 32 for 1-byte (int8/fp8).
    itemsize = jnp.dtype(dtype).itemsize
    return {4: 8, 2: 16, 1: 32}.get(itemsize, 8)


def _per_block_budget_bytes() -> int:
    # Generation-dependent per-block budget.  Total pipelined footprint is
    # ~4x this (in + out, double-buffered): 8 MiB on v5e (16 MiB scoped
    # default), 16 MiB on v6e/v7x (32 MiB scoped default).
    try:
        kind = jax.devices()[0].device_kind.lower()
    except Exception:
        kind = ""
    if ("v5 lite" in kind) or ("v5e" in kind) or ("v5litepod" in kind):
        return 2 << 20
    return 4 << 20


def chomp1d(x: jax.Array, chomp_size: int, *, min_pallas_bytes: int = 1 << 20) -> jax.Array:
    """Drop the last `chomp_size` elements along the last axis of (N, C, L)."""
    n, c, l = x.shape
    assert 0 <= chomp_size < l, "chomp_size must be in [0, L)"
    if chomp_size == 0:
        # Intended (non-empty) semantics of Chomp1d with chomp_size == 0.
        return x
    l_out = l - chomp_size
    rows = n * c
    itemsize = jnp.dtype(x.dtype).itemsize

    # Small-shape fast path: kernel launch overhead dominates tiny copies and
    # a plain XLA slice fuses into the consumer for free.
    if rows * l_out * itemsize < min_pallas_bytes:
        return x[:, :, :l_out]

    sub = _sublane_multiple(x.dtype)
    rows_padded = _round_up(rows, sub)
    l_padded = _round_up(l_out, _LANE)
    block_budget = _per_block_budget_bytes()

    # Prefer a single column tile covering all of L_out (fits the budget even
    # at minimum row height); otherwise use the largest lane multiple that does.
    tl_max = max(_LANE, ((block_budget // (sub * itemsize)) // _LANE) * _LANE)
    tl = min(l_padded, tl_max)
    # Largest row tile (multiple of `sub`) that keeps tr*tl within the budget.
    tr = max(sub, min(rows_padded, ((block_budget // (tl * itemsize)) // sub) * sub))

    # Megacore: guarantee >= 2 row tiles when possible so both v7x TensorCores
    # get work (no effect on single-TC v5e/v6e).
    if rows_padded >= 2 * sub and _cdiv(rows, tr) < 2:
        tr = min(tr, _round_up(_cdiv(rows, 2), sub))

    block_bytes = tr * tl * itemsize
    vmem_limit = min(32 << 20, max(16 << 20, 4 * block_bytes + (4 << 20)))

    x2d = x.reshape(rows, l)  # row-major view; free for XLA

    out2d = pl.pallas_call(
        _chomp_copy_kernel,
        out_shape=jax.ShapeDtypeStruct((rows, l_out), x.dtype),
        grid_spec=pl.GridSpec(
            grid=(_cdiv(rows, tr), _cdiv(l_out, tl)),
            in_specs=[
                # Only column tiles covering [0, L_out) are indexed; when
                # tl == round_up(L_out, 128) (the common case) the chomped
                # tail is never fetched from HBM.
                pl.BlockSpec((tr, tl), lambda r, t: (r, t)),
            ],
            out_specs=pl.BlockSpec((tr, tl), lambda r, t: (r, t)),
        ),
        compiler_params=pltpu.CompilerParams(
            dimension_semantics=("parallel", "parallel"),
            vmem_limit_bytes=vmem_limit,
        ),
        cost_estimate=pl.CostEstimate(
            flops=0,
            transcendentals=0,
            bytes_accessed=2 * rows * l_out * itemsize,
        ),
    )(x2d)

    return out2d.reshape(n, c, l_out)


if __name__ == "__main__":
    key = jax.random.PRNGKey(0)

    # 1) Small TCN-style shape, forced through the Pallas path (min_pallas_bytes=0).
    N, C, L = 2, 4, 16
    chomp_size = 3
    x = jax.random.normal(key, (N, C, L), dtype=jnp.float32)
    out = jax.block_until_ready(chomp1d(x, chomp_size, min_pallas_bytes=0))
    ref = x[:, :, :-chomp_size]
    assert out.shape == (N, C, L - chomp_size), out.shape
    assert jnp.array_equal(out, ref), "mismatch vs. reference slice"

    # 2) Ragged rows (N*C not a multiple of the sublane step) and ragged length,
    #    in bf16 to exercise the dtype-aware sublane rounding; forced Pallas path.
    key2 = jax.random.PRNGKey(0)
    N2, C2, L2, chomp2 = 2, 5, 200, 7
    x2 = jax.random.normal(key2, (N2, C2, L2), dtype=jnp.bfloat16)
    out2 = jax.block_until_ready(chomp1d(x2, chomp2, min_pallas_bytes=0))
    ref2 = x2[:, :, :-chomp2]
    assert out2.shape == (N2, C2, L2 - chomp2), out2.shape
    assert jnp.array_equal(out2, ref2), "mismatch vs. reference slice (ragged/bf16)"

    # 3) Default small-shape fast path (plain XLA slice).
    out3 = jax.block_until_ready(chomp1d(x, chomp_size))
    assert jnp.array_equal(out3, ref), "mismatch vs. reference slice (fast path)"

    print("KERNEL_OK")
</pallas_src>

<mosaic_0001>
module attributes {stable_mosaic.version = 11 : i64} {
  func.func @_chomp_copy_kernel(%arg0: i32, %arg1: i32, %arg2: memref<8x128xf32, #tpu.memory_space<vmem>>, %arg3: memref<8x128xf32, #tpu.memory_space<vmem>>) attributes {dimension_semantics = [#tpu.dimension_semantics<parallel>, #tpu.dimension_semantics<parallel>], iteration_bounds = array<i64: 1, 1>, scalar_prefetch = 0 : i64, scratch_operands = 0 : i64, tpu.core_type = #tpu.core_type<tc>, window_params = [{transform_indices = @transform_0, window_bounds = array<i64: 8, 128>}, {transform_indices = @transform_1, window_bounds = array<i64: 8, 128>}]} {
    %c0 = arith.constant 0 : index
    %c0_0 = arith.constant 0 : index
    %0 = vector.load %arg2[%c0, %c0_0] : memref<8x128xf32, #tpu.memory_space<vmem>>, vector<8x128xf32>
    %c0_1 = arith.constant 0 : index
    %c0_2 = arith.constant 0 : index
    %1 = vector.load %arg3[%c0_1, %c0_2] : memref<8x128xf32, #tpu.memory_space<vmem>>, vector<8x128xf32>
    tpu.vector_store %arg3[%c0_1, %c0_2], %0 {strides = array<i32>} : memref<8x128xf32, #tpu.memory_space<vmem>>, vector<8x128xf32>,
    return
  }
  func.func @transform_0(%arg0: i32, %arg1: i32) -> (i32, i32) {
    %c0_i32 = arith.constant 0 : i32
    return %arg0, %arg1 : i32, i32
  }
  func.func @transform_1(%arg0: i32, %arg1: i32) -> (i32, i32) {
    %c0_i32 = arith.constant 0 : i32
    return %arg0, %arg1 : i32, i32
  }
}

</mosaic_0001>

<bundles_post_ra>
// kernel: tpu_custom_call.1
= control target key start
LH: loop header
LB: loop body
LE: loop exit
PB: predicated region body
PF: predicated region fallthrough
CT: control target
= control target key end

     0   :  { %6 = vsyncpa [#allocation3], 0  ;;  %s124_s0 = inlined_call_operand.hbm [shape: f32[8,16], index: 0, kind: input, shape index: {}]   ;;  %s125_s1 = inlined_call_operand.hbm [shape: f32[8,13], index: 1, kind: output, shape index: {}]  }
   0x1   :  { %7 = vsyncpa [#allocation4], 0  ;;  %s88_s6 = smov [#allocation2]   ;;  %s40_s10 = scalar_lea.hbm %s124_s0, 128 }
   0x2   :  { %s14_s7 = sshll.u32 %s88_s6, 4  ;;  %p41_p0 = scmp.ne.s32.totalorder %s124_s0, %s40_s10  ;;  %s15_s7 = int_to_ptr.vmem [resolvable:$true] %s14_s7 }
   0x3   :  { %p44_p1 = scmp.lt.u32.totalorder %s40_s10, %s124_s0 }
   0x5   :  { %p46_p2 = pnand %p44_p1, %p41_p0 }
   0x7   :  { %49 = shalt.err (!%p46_p2)
}
   0x8   :  { %s50_s15 = scalar_lea.vmem %s15_s7, 128  ;;  %p55_p4 = scmp.lt.s32.totalorder %s15_s7, %s15_s7 }
   0x9   :  { %p51_p3 = scmp.ne.s32.totalorder %s15_s7, %s50_s15  ;;  %p56_p5 = scmp.lt.s32.totalorder %s50_s15, %s50_s15 }
   0xb   :  { %p57_p6 = por %p56_p5, %p55_p4 }
   0xd   :  { %p58_p7 = pnand %p57_p6, %p51_p3 }
   0xf   :  { %61 = shalt.err (!%p58_p7)
}
  0x10   :  { %17 = dma.hbm_to_vmem [thread:$0]  %s124_s0, 128, %s15_s7, [#allocation3]  }
  0x11   :  { %84 = dma.done.wait [#allocation3], 128  }
  0x12   :  { %85 = vsyncadd [#allocation3], 4294967168  ;;  %s89_s18 = smov [#allocation5]   ;;  %v21_v0 = vld [vmem:[#allocation2] sm:$0xff] }
  0x13   :  { %s29_s19 = sshll.u32 %s89_s18, 4  ;;  %22 = vst [vmem:[#allocation5] sm:$0xff] %v21_v0  ;;  %s30_s19 = int_to_ptr.vmem [resolvable:$true] %s29_s19 }
  0x14   :  { %s62_s20 = scalar_lea.vmem %s30_s19, 128  ;;  %p67_p9 = scmp.lt.s32.totalorder %s30_s19, %s30_s19 }
  0x15   :  { %p63_p8 = scmp.ne.s32.totalorder %s30_s19, %s62_s20  ;;  %p68_p10 = scmp.lt.s32.totalorder %s62_s20, %s62_s20 }
  0x17   :  { %p69_p11 = por %p68_p10, %p67_p9 }
  0x19   :  { %p70_p12 = pnand %p69_p11, %p63_p8 }
  0x1b   :  { %73 = shalt.err (!%p70_p12)
}
  0x1c   :  { %s74_s23 = scalar_lea.hbm %s125_s1, 128 }
  0x1d   :  { %p75_p13 = scmp.ne.s32.totalorder %s125_s1, %s74_s23  ;;  %p78_p0 = scmp.lt.u32.totalorder %s74_s23, %s125_s1 }
  0x1f   :  { %p80_p1 = pnand %p78_p0, %p75_p13 }
  0x21   :  { %83 = shalt.err (!%p80_p1)
}
  0x22   :  { %32 = dma.vmem_to_hbm [thread:$0]  %s30_s19, 128, %s125_s1, [#allocation4]  }
  0x23   :  { %86 = dma.done.wait [#allocation4], 128  }
  0x24   :  { %87 = vsyncadd [#allocation4], 4294967168 }
  0x25   :  { %36 = vsyncpa [#allocation3], 1 }
  0x26   :  { %37 = vsyncpa [#allocation4], 1 }

</bundles_post_ra>
